<compile_context>
chip_gen: v7x
topology: tpu7x:2x2x1
jax: 0.10.0
libtpu: 0.0.40
codegen_flags: <defaults>
</compile_context>

<pallas_src>
import functools

import jax
import jax.numpy as jnp
from jax.experimental import pallas as pl
from jax.experimental.pallas import tpu as pltpu

LANE = 128
MAX_BLOCK_B = 1024   # fits comfortably in default scoped VMEM on v5e/v6e/v7x


def _round_up(x, m):
    return ((x + m - 1) // m) * m


def _pick_block_b(B):
    """Batch tile: as large as possible up to MAX_BLOCK_B, multiple of 8."""
    return min(MAX_BLOCK_B, _round_up(max(B, 1), 8))


def risk_mlp_kernel(x_ref, w1_ref, b1_ref, w2_ref, b2_ref, w3_ref, b3_ref,
                    out_ref):
    # x is kept f32 in HBM (tiny); cast to the MXU compute dtype in-register.
    x = x_ref[...].astype(w1_ref.dtype)                       # (TB, Kp)

    # Layer 1: Linear + ReLU (f32 accumulation).
    h1 = jnp.dot(x, w1_ref[...], preferred_element_type=jnp.float32) + b1_ref[...]
    h1 = jnp.maximum(h1, 0.0).astype(w2_ref.dtype)

    # Layer 2: Linear + ReLU (full 128x128 MXU tile after hidden padding).
    h2 = jnp.dot(h1, w2_ref[...], preferred_element_type=jnp.float32) + b2_ref[...]
    h2 = jnp.maximum(h2, 0.0).astype(w3_ref.dtype)

    # Layer 3: Linear (no activation); compact (TB, action_dim) store.
    y = jnp.dot(h2, w3_ref[...], preferred_element_type=jnp.float32) + b3_ref[...]
    out_ref[...] = y.astype(out_ref.dtype)


def prepare_params(params, compute_dtype=jnp.bfloat16):
    """Pad the concat/hidden dims and cast weights to the MXU compute dtype.

    * Input dim (state_dim + action_dim) is padded to a multiple of 32 (clean
      bf16 sublane packing); the wrapper pads x identically with zeros.
    * Hidden dim is padded to 128: padded hidden columns are ReLU(0)=0 and the
      corresponding weight rows are 0, so valid outputs are unaffected.
    * Output dim is NOT padded (compact lane-masked store).
    * Biases stay f32 (added after f32 accumulation).
    """
    w1, b1, w2, b2, w3, b3 = params
    in_dim, hidden = w1.shape
    action_dim = w3.shape[1]
    k_pad = _round_up(in_dim, 32)
    h_pad = _round_up(hidden, LANE)
    dk, dh = k_pad - in_dim, h_pad - hidden

    w1p = jnp.pad(w1, ((0, dk), (0, dh))).astype(compute_dtype)
    b1p = jnp.pad(b1, ((0, 0), (0, dh))).astype(jnp.float32)
    w2p = jnp.pad(w2, ((0, dh), (0, dh))).astype(compute_dtype)
    b2p = jnp.pad(b2, ((0, 0), (0, dh))).astype(jnp.float32)
    w3p = jnp.pad(w3, ((0, dh), (0, 0))).astype(compute_dtype)
    b3p = b3.astype(jnp.float32)
    return (w1p, b1p, w2p, b2p, w3p, b3p)


@functools.partial(jax.jit, static_argnames=("block_b",))
def risk_forward(state, action, prepped, *, block_b=None):
    """state: (B, state_dim), action: (B, action_dim) -> (B, action_dim) f32."""
    w1, b1, w2, b2, w3, b3 = prepped
    B = state.shape[0]
    in_dim = state.shape[1] + action.shape[1]
    k_pad, h_pad = w1.shape
    action_dim = w3.shape[1]

    tb = _round_up(block_b, 8) if block_b is not None else _pick_block_b(B)
    b_pad = _round_up(B, tb)
    grid = (b_pad // tb,)

    # One-time concat (+ K/batch zero-pad); padded rows are sliced off below.
    x = jnp.concatenate([state, action], axis=1).astype(jnp.float32)
    if (b_pad != B) or (k_pad != in_dim):
        x = jnp.pad(x, ((0, b_pad - B), (0, k_pad - in_dim)))

    def batch_spec(feat):
        return pl.BlockSpec((tb, feat), lambda i: (i, 0))

    def resident_spec(shape):
        # Constant index_map -> tile fetched once, stays VMEM-resident.
        return pl.BlockSpec(shape, lambda i: (0, 0))

    wbytes = sum(int(p.size) * p.dtype.itemsize for p in prepped)
    flops = 2 * b_pad * (k_pad * h_pad + h_pad * h_pad + h_pad * action_dim)
    bytes_accessed = 4 * b_pad * k_pad + wbytes + 4 * b_pad * action_dim

    out_padded = pl.pallas_call(
        risk_mlp_kernel,
        out_shape=jax.ShapeDtypeStruct((b_pad, action_dim), jnp.float32),
        grid=grid,
        in_specs=[
            batch_spec(k_pad),
            resident_spec(w1.shape), resident_spec(b1.shape),
            resident_spec(w2.shape), resident_spec(b2.shape),
            resident_spec(w3.shape), resident_spec(b3.shape),
        ],
        out_specs=batch_spec(action_dim),
        compiler_params=pltpu.CompilerParams(dimension_semantics=("parallel",)),
        cost_estimate=pl.CostEstimate(flops=flops, transcendentals=0,
                                      bytes_accessed=bytes_accessed),
    )(x, w1, b1, w2, b2, w3, b3)

    return out_padded[:B] if b_pad != B else out_padded


def init_params(key, state_dim, action_dim, hidden_dim):
    """PyTorch nn.Linear-style init (U(-k, k), k=1/sqrt(fan_in)).
    Weights stored as (in_features, out_features)."""
    dims = [(state_dim + action_dim, hidden_dim),
            (hidden_dim, hidden_dim),
            (hidden_dim, action_dim)]
    params = []
    for (fan_in, fan_out) in dims:
        key, kw, kb = jax.random.split(key, 3)
        bound = 1.0 / (fan_in ** 0.5)
        w = jax.random.uniform(kw, (fan_in, fan_out), jnp.float32, -bound, bound)
        b = jax.random.uniform(kb, (1, fan_out), jnp.float32, -bound, bound)
        params += [w, b]
    return tuple(params)


def risk_reference(state, action, params):
    """Pure-JAX reference (mirrors the PyTorch module exactly)."""
    w1, b1, w2, b2, w3, b3 = params
    x = jnp.concatenate([state, action], axis=1)
    h1 = jnp.maximum(x @ w1 + b1, 0.0)
    h2 = jnp.maximum(h1 @ w2 + b2, 0.0)
    return h2 @ w3 + b3


if __name__ == "__main__":
    state_dim, action_dim, hidden_dim = 16, 8, 32
    batch = 2

    key = jax.random.PRNGKey(0)
    kp, ks, ka = jax.random.split(key, 3)

    params = init_params(kp, state_dim, action_dim, hidden_dim)
    state = jax.random.normal(ks, (batch, state_dim), jnp.float32)
    action = jax.random.normal(ka, (batch, action_dim), jnp.float32)

    ref = risk_reference(state, action, params)

    # Exact-parity f32 path (compute dtype = f32): tight tolerance.
    prepped_f32 = prepare_params(params, compute_dtype=jnp.float32)
    out_f32 = jax.block_until_ready(risk_forward(state, action, prepped_f32))
    assert out_f32.shape == (batch, action_dim)
    assert jnp.allclose(out_f32, ref, atol=1e-5, rtol=1e-5), "f32 mismatch vs reference"

    # bf16-operand MXU path (default on v5e/v6e): f32 accumulation, loose tolerance.
    prepped_bf16 = prepare_params(params, compute_dtype=jnp.bfloat16)
    out_bf16 = jax.block_until_ready(risk_forward(state, action, prepped_bf16))
    assert out_bf16.shape == (batch, action_dim)
    assert jnp.allclose(out_bf16, ref, atol=5e-2, rtol=5e-2), "bf16 mismatch vs reference"

    print("KERNEL_OK")
</pallas_src>

<mosaic_0001>
module attributes {stable_mosaic.version = 11 : i64} {
  func.func @risk_mlp_kernel(%arg0: i32, %arg1: memref<8x32xf32, #tpu.memory_space<vmem>>, %arg2: memref<32x128xf32, #tpu.memory_space<vmem>>, %arg3: memref<1x128xf32, #tpu.memory_space<vmem>>, %arg4: memref<128x128xf32, #tpu.memory_space<vmem>>, %arg5: memref<1x128xf32, #tpu.memory_space<vmem>>, %arg6: memref<128x8xf32, #tpu.memory_space<vmem>>, %arg7: memref<1x8xf32, #tpu.memory_space<vmem>>, %arg8: memref<8x8xf32, #tpu.memory_space<vmem>>) attributes {dimension_semantics = [#tpu.dimension_semantics<parallel>], iteration_bounds = array<i64: 1>, scalar_prefetch = 0 : i64, scratch_operands = 0 : i64, tpu.core_type = #tpu.core_type<tc>, window_params = [{transform_indices = @transform_0, window_bounds = array<i64: 8, 32>}, {pipeline_mode = #tpu.pipeline_mode<synchronous>, transform_indices = @transform_1, window_bounds = array<i64: 32, 128>}, {pipeline_mode = #tpu.pipeline_mode<synchronous>, transform_indices = @transform_2, window_bounds = array<i64: 1, 128>}, {pipeline_mode = #tpu.pipeline_mode<synchronous>, transform_indices = @transform_3, window_bounds = array<i64: 128, 128>}, {pipeline_mode = #tpu.pipeline_mode<synchronous>, transform_indices = @transform_4, window_bounds = array<i64: 1, 128>}, {pipeline_mode = #tpu.pipeline_mode<synchronous>, transform_indices = @transform_5, window_bounds = array<i64: 128, 8>}, {pipeline_mode = #tpu.pipeline_mode<synchronous>, transform_indices = @transform_6, window_bounds = array<i64: 1, 8>}, {transform_indices = @transform_7, window_bounds = array<i64: 8, 8>}]} {
    %c0 = arith.constant 0 : index
    %c0_0 = arith.constant 0 : index
    %0 = vector.load %arg1[%c0, %c0_0] : memref<8x32xf32, #tpu.memory_space<vmem>>, vector<8x32xf32>
    %c0_1 = arith.constant 0 : index
    %c0_2 = arith.constant 0 : index
    %1 = vector.load %arg2[%c0_1, %c0_2] : memref<32x128xf32, #tpu.memory_space<vmem>>, vector<32x128xf32>
    %cst = arith.constant dense<0.000000e+00> : vector<8x128xf32>
    %2 = tpu.matmul %0, %1, %cst {dimension_numbers = #tpu.dot_dimension_numbers<[1], [0], [0], [1], [0, 0, 1, 1], [], []>} : vector<8x32xf32>, vector<32x128xf32>, vector<8x128xf32> -> vector<8x128xf32>
    %c0_3 = arith.constant 0 : index
    %c0_4 = arith.constant 0 : index
    %3 = vector.load %arg3[%c0_3, %c0_4] : memref<1x128xf32, #tpu.memory_space<vmem>>, vector<1x128xf32>
    %4 = vector.broadcast %3 : vector<1x128xf32> to vector<8x128xf32>
    %5 = arith.addf %2, %4 : vector<8x128xf32>
    %cst_5 = arith.constant 0.000000e+00 : f32
    %6 = vector.broadcast %cst_5 : f32 to vector<8x128xf32>
    %7 = arith.maximumf %5, %6 : vector<8x128xf32>
    %c0_6 = arith.constant 0 : index
    %c0_7 = arith.constant 0 : index
    %8 = vector.load %arg4[%c0_6, %c0_7] : memref<128x128xf32, #tpu.memory_space<vmem>>, vector<128x128xf32>
    %cst_8 = arith.constant dense<0.000000e+00> : vector<8x128xf32>
    %9 = tpu.matmul %7, %8, %cst_8 {dimension_numbers = #tpu.dot_dimension_numbers<[1], [0], [0], [1], [0, 0, 1, 1], [], []>} : vector<8x128xf32>, vector<128x128xf32>, vector<8x128xf32> -> vector<8x128xf32>
    %c0_9 = arith.constant 0 : index
    %c0_10 = arith.constant 0 : index
    %10 = vector.load %arg5[%c0_9, %c0_10] : memref<1x128xf32, #tpu.memory_space<vmem>>, vector<1x128xf32>
    %11 = vector.broadcast %10 : vector<1x128xf32> to vector<8x128xf32>
    %12 = arith.addf %9, %11 : vector<8x128xf32>
    %cst_11 = arith.constant 0.000000e+00 : f32
    %13 = vector.broadcast %cst_11 : f32 to vector<8x128xf32>
    %14 = arith.maximumf %12, %13 : vector<8x128xf32>
    %c0_12 = arith.constant 0 : index
    %c0_13 = arith.constant 0 : index
    %15 = vector.load %arg6[%c0_12, %c0_13] : memref<128x8xf32, #tpu.memory_space<vmem>>, vector<128x8xf32>
    %cst_14 = arith.constant dense<0.000000e+00> : vector<8x8xf32>
    %16 = tpu.matmul %14, %15, %cst_14 {dimension_numbers = #tpu.dot_dimension_numbers<[1], [0], [0], [1], [0, 0, 1, 1], [], []>} : vector<8x128xf32>, vector<128x8xf32>, vector<8x8xf32> -> vector<8x8xf32>
    %c0_15 = arith.constant 0 : index
    %c0_16 = arith.constant 0 : index
    %17 = vector.load %arg7[%c0_15, %c0_16] : memref<1x8xf32, #tpu.memory_space<vmem>>, vector<1x8xf32>
    %18 = vector.broadcast %17 : vector<1x8xf32> to vector<8x8xf32>
    %19 = arith.addf %16, %18 : vector<8x8xf32>
    %c0_17 = arith.constant 0 : index
    %c0_18 = arith.constant 0 : index
    %20 = vector.load %arg8[%c0_17, %c0_18] : memref<8x8xf32, #tpu.memory_space<vmem>>, vector<8x8xf32>
    tpu.vector_store %arg8[%c0_17, %c0_18], %19 {strides = array<i32>} : memref<8x8xf32, #tpu.memory_space<vmem>>, vector<8x8xf32>,
    return
  }
  func.func @transform_0(%arg0: i32) -> (i32, i32) {
    %c0_i32 = arith.constant 0 : i32
    %c0_i32_0 = arith.constant 0 : i32
    return %arg0, %c0_i32 : i32, i32
  }
  func.func @transform_1(%arg0: i32) -> (i32, i32) {
    %c0_i32 = arith.constant 0 : i32
    %c0_i32_0 = arith.constant 0 : i32
    %c0_i32_1 = arith.constant 0 : i32
    return %c0_i32, %c0_i32_0 : i32, i32
  }
  func.func @transform_2(%arg0: i32) -> (i32, i32) {
    %c0_i32 = arith.constant 0 : i32
    %c0_i32_0 = arith.constant 0 : i32
    %c0_i32_1 = arith.constant 0 : i32
    return %c0_i32, %c0_i32_0 : i32, i32
  }
  func.func @transform_3(%arg0: i32) -> (i32, i32) {
    %c0_i32 = arith.constant 0 : i32
    %c0_i32_0 = arith.constant 0 : i32
    %c0_i32_1 = arith.constant 0 : i32
    return %c0_i32, %c0_i32_0 : i32, i32
  }
  func.func @transform_4(%arg0: i32) -> (i32, i32) {
    %c0_i32 = arith.constant 0 : i32
    %c0_i32_0 = arith.constant 0 : i32
    %c0_i32_1 = arith.constant 0 : i32
    return %c0_i32, %c0_i32_0 : i32, i32
  }
  func.func @transform_5(%arg0: i32) -> (i32, i32) {
    %c0_i32 = arith.constant 0 : i32
    %c0_i32_0 = arith.constant 0 : i32
    %c0_i32_1 = arith.constant 0 : i32
    return %c0_i32, %c0_i32_0 : i32, i32
  }
  func.func @transform_6(%arg0: i32) -> (i32, i32) {
    %c0_i32 = arith.constant 0 : i32
    %c0_i32_0 = arith.constant 0 : i32
    %c0_i32_1 = arith.constant 0 : i32
    return %c0_i32, %c0_i32_0 : i32, i32
  }
  func.func @transform_7(%arg0: i32) -> (i32, i32) {
    %c0_i32 = arith.constant 0 : i32
    %c0_i32_0 = arith.constant 0 : i32
    return %arg0, %c0_i32 : i32, i32
  }
}

</mosaic_0001>

<bundles_post_ra>
// kernel: risk_forward.1
= control target key start
LH: loop header
LB: loop body
LE: loop exit
PB: predicated region body
PF: predicated region fallthrough
CT: control target
= control target key end

     0   :  { %v487_v0 = vmov 0.0|0.0   ;;  %vm488_vm0 = vmmov 0   ;;  %v489_v4 = vmov 0.0   ;;  %vm38_vm1 = vcmask 261120   ;;  %s674_s1 = inlined_call_operand.vmem [shape: f32[32,128], index: 1, kind: input, shape index: {}]   ;;  %s675_s3 = inlined_call_operand.vmem [shape: f32[128,128], index: 3, kind: input, shape index: {}]   ;;  %s676_s0 = inlined_call_operand.vmem [shape: f32[8,32], index: 0, kind: input, shape index: {}]   ;;  %s677_s5 = inlined_call_operand.vmem [shape: f32[128,8], index: 5, kind: input, shape index: {}]   ;;  %s678_s2 = inlined_call_operand.vmem [shape: f32[1,128], index: 2, kind: input, shape index: {}]   ;;  %s679_s4 = inlined_call_operand.vmem [shape: f32[1,128], index: 4, kind: input, shape index: {}]   ;;  %s680_s6 = inlined_call_operand.vmem [shape: f32[1,8], index: 6, kind: input, shape index: {}]   ;;  %s681_s7 = inlined_call_operand.vmem [shape: f32[8,8], index: 7, kind: output, shape index: {}]  }
   0x1   :  { %430 = vmatprep.subr.bf16.mxu0 %v487_v0  ;;  %v27_v1 = vld [vmem:[%s674_s1] sm:$0xff]  ;;  %v28_v2 = vld [vmem:[%s674_s1 + $0x8] sm:$0xff]  ;;  %v29_v3 = vld [vmem:[%s674_s1 + $0x10] sm:$0xff]  ;;  %357 = vmatprep.mubr.msk.f32.mxu0 %vm488_vm0, %v489_v4  ;;  %vm300_vm2 = vcmask 64512  }
   0x2   :  { %v431_v5 = vpack.c.bf16 %v28_v2, %v27_v1  ;;  %v30_v6 = vld [vmem:[%s674_s1 + $0x18] sm:$0xff]  ;;  %436 = vmatprep.subr.bf16.mxu1 %v487_v0  ;;  %v113_v7 = vld [vmem:[%s675_s3] sm:$0xff]  ;;  %392 = vmatprep.mubr.msk.f32.mxu1 %vm488_vm0, %v489_v4  ;;  %v114_v8 = vld [vmem:[%s675_s3 + $0x8] sm:$0xff] }
   0x3   :  { %v115_v9 = vld [vmem:[%s675_s3 + $0x10] sm:$0xff]  ;;  %v116_v10 = vld [vmem:[%s675_s3 + $0x18] sm:$0xff]  ;;  %v434_v11 = vpack.c.bf16 %v30_v6, %v29_v3  ;;  %v437_v12 = vpack.c.bf16 %v114_v8, %v113_v7  ;;  %v117_v14 = vld [vmem:[%s675_s3 + $0x20] sm:$0xff] }
   0x4   :  { %432 = vmatpush3.bf16.msra.mxu0 %v431_v5  ;;  %v440_v13 = vpack.c.bf16 %v116_v10, %v115_v9  ;;  %v118_v15 = vld [vmem:[%s675_s3 + $0x28] sm:$0xff]  ;;  %v26_v16 = vld [vmem:[%s676_s0] sm:$0xff]  ;;  %v119_v18 = vld [vmem:[%s675_s3 + $0x30] sm:$0xff] }
   0x5   :  { %433 = vmatprep.subr.bf16.mxu0 %v487_v0  ;;  %438 = vmatpush3.bf16.msra.mxu1 %v437_v12  ;;  %v443_v17 = vpack.c.bf16 %v118_v15, %v117_v14  ;;  %v120_v19 = vld [vmem:[%s675_s3 + $0x38] sm:$0xff]  ;;  %v121_v21 = vld [vmem:[%s675_s3 + $0x40] sm:$0xff]  ;;  %v122_v22 = vld [vmem:[%s675_s3 + $0x48] sm:$0xff] }
   0x6   :  { %439 = vmatprep.subr.bf16.mxu1 %v487_v0  ;;  %v446_v20 = vpack.c.bf16 %v120_v19, %v119_v18  ;;  %v449_v23 = vpack.c.bf16 %v122_v22, %v121_v21  ;;  %v123_v24 = vld [vmem:[%s675_s3 + $0x50] sm:$0xff]  ;;  %v124_v25 = vld [vmem:[%s675_s3 + $0x58] sm:$0xff]  ;;  %v125_v27 = vld [vmem:[%s675_s3 + $0x60] sm:$0xff] }
   0x7   :  { %v452_v26 = vpack.c.bf16 %v124_v25, %v123_v24  ;;  %v126_v28 = vld [vmem:[%s675_s3 + $0x68] sm:$0xff]  ;;  %v127_v30 = vld [vmem:[%s675_s3 + $0x70] sm:$0xff]  ;;  %v128_v31 = vld [vmem:[%s675_s3 + $0x78] sm:$0xff] }
   0x8   :  { %435 = vmatpush3.bf16.msra.mxu0 %v434_v11  ;;  %v455_v29 = vpack.c.bf16 %v126_v28, %v125_v27  ;;  %v458_v32 = vpack.c.bf16 %v128_v31, %v127_v30  ;;  %v207_v33 = vld [vmem:[%s677_s5] sm:$0xff]  ;;  %v208_v34 = vld [vmem:[%s677_s5 + $0x8] sm:$0xff]  ;;  %v209_v35 = vld [vmem:[%s677_s5 + $0x10] sm:$0xff] }
   0x9   :  { %460 = vmatprep.subr.bf16.mxu0 %v487_v0  ;;  %441 = vmatpush3.bf16.msra.mxu1 %v440_v13  ;;  %v461_v36 = vpack.c.bf16 %v208_v34, %v207_v33  ;;  %v210_v37 = vld [vmem:[%s677_s5 + $0x18] sm:$0xff]  ;;  %v211_v39 = vld [vmem:[%s677_s5 + $0x20] sm:$0xff]  ;;  %v212_v40 = vld [vmem:[%s677_s5 + $0x28] sm:$0xff] }
   0xa   :  { %442 = vmatprep.subr.bf16.mxu1 %v487_v0  ;;  %v464_v38 = vpack.c.bf16 %v210_v37, %v209_v35  ;;  %v467_v41 = vpack.c.bf16 %v212_v40, %v211_v39  ;;  %v213_v42 = vld [vmem:[%s677_s5 + $0x30] sm:$0xff]  ;;  %v214_v43 = vld [vmem:[%s677_s5 + $0x38] sm:$0xff]  ;;  %v215_v45 = vld [vmem:[%s677_s5 + $0x40] sm:$0xff] }
   0xb   :  { %358 = vmatmul.mubr.msk.f32.vlgmr.msra.gmra.mrb[0].mxu0 %vm38_vm1, %v26_v16  ;;  %v470_v44 = vpack.c.bf16 %v214_v43, %v213_v42  ;;  %v216_v46 = vld [vmem:[%s677_s5 + $0x48] sm:$0xff]  ;;  %v217_v48 = vld [vmem:[%s677_s5 + $0x50] sm:$0xff]  ;;  %v218_v49 = vld [vmem:[%s677_s5 + $0x58] sm:$0xff] }
   0xc   :  { %427 = vmatprep.mubr.msk.f32.mxu0 %vm488_vm0, %v489_v4  ;;  %462 = vmatpush3.bf16.msra.mxu0 %v461_v36  ;;  %v473_v47 = vpack.c.bf16 %v216_v46, %v215_v45  ;;  %v476_v50 = vpack.c.bf16 %v218_v49, %v217_v48  ;;  %v219_v51 = vld [vmem:[%s677_s5 + $0x60] sm:$0xff]  ;;  %v220_v52 = vld [vmem:[%s677_s5 + $0x68] sm:$0xff]  ;;  %v221_v59 = vld [vmem:[%s677_s5 + $0x70] sm:$0xff] }
   0xd   :  { %444 = vmatpush3.bf16.msra.mxu1 %v443_v17  ;;  %463 = vmatprep.subr.bf16.mxu0 %v487_v0  ;;  %v479_v53 = vpack.c.bf16 %v220_v52, %v219_v51  ;;  %v306_v54 = vld [vmem:[%s678_s2] ss:$0 sm:$0xff]  ;;  %v222_v60 = vld [vmem:[%s677_s5 + $0x78] sm:$0xff] }
   0xe   :  { %445 = vmatprep.subr.bf16.mxu1 %v487_v0  ;;  %v482_v61 = vpack.c.bf16 %v222_v60, %v221_v59  ;;  %v308_v62 = vld [vmem:[%s679_s4] ss:$0 sm:$0xff] }
   0xf   :  { %v309_v3 = vld [vmem:[%s680_s6] ss:$0 sm:$0xff] }
  0x10   :  { %465 = vmatpush3.bf16.msra.mxu0 %v464_v38 }
  0x11   :  { %447 = vmatpush3.bf16.msra.mxu1 %v446_v20  ;;  %466 = vmatprep.subr.bf16.mxu0 %v487_v0 }
  0x12   :  { %448 = vmatprep.subr.bf16.mxu1 %v487_v0 }
  0x14   :  { %468 = vmatpush3.bf16.msra.mxu0 %v467_v41 }
  0x15   :  { %450 = vmatpush3.bf16.msra.mxu1 %v449_v23  ;;  %469 = vmatprep.subr.bf16.mxu0 %v487_v0 }
  0x16   :  { %451 = vmatprep.subr.bf16.mxu1 %v487_v0 }
  0x18   :  { %471 = vmatpush3.bf16.msra.mxu0 %v470_v44 }
  0x19   :  { %453 = vmatpush3.bf16.msra.mxu1 %v452_v26  ;;  %472 = vmatprep.subr.bf16.mxu0 %v487_v0 }
  0x1a   :  { %454 = vmatprep.subr.bf16.mxu1 %v487_v0 }
  0x1c   :  { %474 = vmatpush3.bf16.msra.mxu0 %v473_v47 }
  0x1d   :  { %456 = vmatpush3.bf16.msra.mxu1 %v455_v29  ;;  %475 = vmatprep.subr.bf16.mxu0 %v487_v0 }
  0x1e   :  { %457 = vmatprep.subr.bf16.mxu1 %v487_v0 }
  0x20   :  { %477 = vmatpush3.bf16.msra.mxu0 %v476_v50 }
  0x21   :  { %459 = vmatpush3.bf16.msra.mxu1 %v458_v32  ;;  %478 = vmatprep.subr.bf16.mxu0 %v487_v0 }
  0x24   :  { %480 = vmatpush3.bf16.msra.mxu0 %v479_v53 }
  0x25   :  { %481 = vmatprep.subr.bf16.mxu0 %v487_v0 }
  0x28   :  { %483 = vmatpush3.bf16.msra.mxu0 %v482_v61 }
  0xde   :  { %v108_v55 = vpop.f32.mrb[0].mxu0 }
  0xdf   :  { %v109_v56 = vadd.f32 %v306_v54, %v108_v55  ;;  %v359_v57 = vpop.f32.mrb[1].mxu0 }
  0xe1   :  { %v112_v58 = vmax.f32 %v109_v56, 0.0 }
  0xe3   :  { %393 = vmatmul.mubr.f32.vlgmr.msra.gmra.mrb[0].mxu1 %v112_v58 }
 0x1b6   :  { %v202_v63 = vpop.f32.mrb[0].mxu1 }
 0x1b7   :  { %v203_v0 = vadd.f32 %v308_v62, %v202_v63  ;;  %v394_v1 = vpop.f32.mrb[1].mxu1 }
 0x1b9   :  { %v206_v2 = vmax.f32 %v203_v0, 0.0 }
 0x1bb   :  { %428 = vmatmul.mubr.f32.vlgmr.msra.gmra.mrb[2].mxu0 %v206_v2 }
 0x28e   :  { %v296_v4 = vpop.f32.mrb[2].mxu0 }
 0x28f   :  { %v297_v5 = vadd.f32 %v309_v3, %v296_v4  ;;  %v429_v6 = vpop.f32.mrb[3].mxu0 }
 0x291   :  { %301 = vst.msk [vmem:[%s681_s7] sm:$0xff] %vm300_vm2, %v297_v5 }

</bundles_post_ra>
